<compile_context>
chip_gen: v6e
topology: v6e:2x2x1
jax: 0.10.0
libtpu: 0.0.40
codegen_flags: <defaults>
</compile_context>

<pallas_src>
import math

import jax
import jax.numpy as jnp
from jax import lax
from jax.experimental import pallas as pl
from jax.experimental.pallas import tpu as pltpu


def _round_up(x, m):
    return ((x + m - 1) // m) * m


# ----------------------------------------------------------------------------
# Stage 1: fc (Linear D->D) + L2 row-normalize.  One-shot, grid-less.
# ----------------------------------------------------------------------------
def _fc_normalize_kernel(x_ref, wfc_ref, bfc_ref, feat_ref):
    y = jnp.dot(x_ref[...], wfc_ref[...],
                preferred_element_type=jnp.float32) + bfc_ref[...]
    # 1 / max(||y||, 1e-8)  ==  rsqrt(max(sum(y^2), 1e-16))   (exact identity)
    inv_norm = lax.rsqrt(jnp.maximum(jnp.sum(y * y, axis=1, keepdims=True),
                                     1e-16))
    feat_ref[...] = (y * inv_norm).astype(feat_ref.dtype)


# ----------------------------------------------------------------------------
# Stage 2: stream the class weights and do the cosine matmul.
#   logits_tile = (feats @ W_tile) * (scale / ||W_col||)   (per column, exact)
# ----------------------------------------------------------------------------
def _cosine_logits_kernel(feat_ref, w_ref, cscale_ref, logits_ref):
    f = feat_ref[...].astype(w_ref.dtype)          # bf16 lhs -> bf16 MXU path
    raw = jnp.dot(f, w_ref[...], preferred_element_type=jnp.float32)
    logits_ref[...] = (raw * cscale_ref[...]).astype(logits_ref.dtype)


def cosine_softmax_forward(x, wfc_t, bfc, wcls, scale, *, tn=2048,
                           class_dtype=jnp.bfloat16):
    """x: [B, D]; wfc_t: [D, D] (already transposed so kernel does x @ W^T);
    bfc: [1, D]; wcls: [D, N]; scale: scalar ()."""
    B, D = x.shape
    N = wcls.shape[1]

    # --- stage 1: features = normalize(fc(dropout(x))) ----------------------
    features = pl.pallas_call(
        _fc_normalize_kernel,
        out_shape=jax.ShapeDtypeStruct((B, D), jnp.float32),
    )(x, wfc_t, bfc)

    # --- host-side prep for the class-weight stream --------------------------
    n128 = _round_up(N, 128)
    tile_n = max(128, min(_round_up(tn, 128), n128))   # lane-dense class tile
    n_pad = _round_up(N, tile_n)

    # Fold scale and the per-class inverse column norm into one [1, N] vector
    # (computed once, in f32, from the un-quantized weights).
    inv_colnorm = lax.rsqrt(
        jnp.maximum(jnp.sum(wcls.astype(jnp.float32) ** 2, axis=0,
                            keepdims=True), 1e-16))
    col_scale = (scale * inv_colnorm).astype(jnp.float32)      # [1, N]

    # bf16 stream for the dominant HBM traffic; pad class axis to the tile.
    w_stream = wcls.astype(class_dtype)
    if n_pad != N:
        pad = n_pad - N
        w_stream = jnp.pad(w_stream, ((0, 0), (0, pad)))
        col_scale = jnp.pad(col_scale, ((0, 0), (0, pad)))

    logits_padded = pl.pallas_call(
        _cosine_logits_kernel,
        out_shape=jax.ShapeDtypeStruct((B, n_pad), jnp.float32),
        grid_spec=pltpu.PrefetchScalarGridSpec(
            num_scalar_prefetch=0,
            grid=(n_pad // tile_n,),
            in_specs=[
                pl.BlockSpec((B, D), lambda j: (0, 0)),        # features
                pl.BlockSpec((D, tile_n), lambda j: (0, j)),   # class wts tile
                pl.BlockSpec((1, tile_n), lambda j: (0, j)),   # scale/colnorm
            ],
            out_specs=pl.BlockSpec((B, tile_n), lambda j: (0, j)),
        ),
        compiler_params=pltpu.CompilerParams(
            dimension_semantics=("parallel",),      # megacore-splittable (v7x)
            vmem_limit_bytes=32 * 1024 * 1024),
    )(features, w_stream, col_scale)

    return features, logits_padded[:, :N]


# ----------------------------------------------------------------------------
# Parameter init mirroring the PyTorch module's __init__, plus a JAX reference.
# ----------------------------------------------------------------------------
def init_params(key, features_dim, nclass):
    k_w, k_s, k_fc_w, k_fc_b = jax.random.split(key, 4)

    # self.weights: xavier_uniform_ on shape (features_dim, nclass)
    limit = math.sqrt(6.0 / (features_dim + nclass))
    weights = jax.random.uniform(k_w, (features_dim, nclass), jnp.float32,
                                 minval=-limit, maxval=limit)

    # self.scale = softplus(randn(()))
    scale = jax.nn.softplus(jax.random.normal(k_s, (), jnp.float32))

    # nn.Linear(D, D): uniform(-1/sqrt(D), 1/sqrt(D)) weight & bias (default)
    bound_w = math.sqrt(1.0 / features_dim)
    fc_w = jax.random.uniform(k_fc_w, (features_dim, features_dim), jnp.float32,
                              minval=-bound_w, maxval=bound_w)   # [out, in]
    fc_b = jax.random.uniform(k_fc_b, (1, features_dim), jnp.float32,
                              minval=-bound_w, maxval=bound_w)

    # kernel consumes W^T so it can do x @ Wfc_T
    return weights, scale, fc_w.T, fc_b


def reference_forward(x, fc_w_t, fc_b, weights, scale):
    y = x @ fc_w_t + fc_b
    feats = y / jnp.maximum(jnp.linalg.norm(y, axis=1, keepdims=True), 1e-8)
    wn = weights / jnp.maximum(jnp.linalg.norm(weights, axis=0, keepdims=True),
                               1e-8)
    logits = scale * (feats @ wn)
    return feats, logits


if __name__ == "__main__":
    B = 8             # batch
    D = 32            # features_dim
    NCLASS = 300      # deliberately NOT a multiple of 128 (exercises padding;
                      # the module default 11014 is handled the same way)

    key = jax.random.PRNGKey(0)
    k_params, k_x = jax.random.split(key)

    weights, scale, fc_w_t, fc_b = init_params(k_params, D, NCLASS)
    x = jax.random.normal(k_x, (B, D), jnp.float32)

    feats, logits = cosine_softmax_forward(x, fc_w_t, fc_b, weights, scale,
                                           tn=2048)
    jax.block_until_ready((feats, logits))

    assert feats.shape == (B, D) and logits.shape == (B, NCLASS)

    # sanity-check against a pure-JAX f32 reference
    ref_feats, ref_logits = reference_forward(x, fc_w_t, fc_b, weights, scale)
    assert jnp.allclose(feats, ref_feats, atol=1e-5, rtol=1e-4)
    # class weights are streamed in bf16 -> slightly relaxed logits tolerance
    assert jnp.allclose(logits, ref_logits, atol=2e-2, rtol=2e-2)

    print("KERNEL_OK")
</pallas_src>

<mosaic_0001>
module attributes {stable_mosaic.version = 11 : i64} {
  func.func @_fc_normalize_kernel(%arg0: memref<8x32xf32, #tpu.memory_space<vmem>>, %arg1: memref<32x32xf32, #tpu.memory_space<vmem>>, %arg2: memref<1x32xf32, #tpu.memory_space<vmem>>, %arg3: memref<8x32xf32, #tpu.memory_space<vmem>>) attributes {dimension_semantics = [], scalar_prefetch = 0 : i64, scratch_operands = 0 : i64, tpu.core_type = #tpu.core_type<tc>} {
    %c0 = arith.constant 0 : index
    %c0_0 = arith.constant 0 : index
    %0 = vector.load %arg0[%c0, %c0_0] : memref<8x32xf32, #tpu.memory_space<vmem>>, vector<8x32xf32>
    %c0_1 = arith.constant 0 : index
    %c0_2 = arith.constant 0 : index
    %1 = vector.load %arg1[%c0_1, %c0_2] : memref<32x32xf32, #tpu.memory_space<vmem>>, vector<32x32xf32>
    %cst = arith.constant dense<0.000000e+00> : vector<8x32xf32>
    %2 = tpu.matmul %0, %1, %cst {dimension_numbers = #tpu.dot_dimension_numbers<[1], [0], [0], [1], [0, 0, 1, 1], [], []>} : vector<8x32xf32>, vector<32x32xf32>, vector<8x32xf32> -> vector<8x32xf32>
    %c0_3 = arith.constant 0 : index
    %c0_4 = arith.constant 0 : index
    %3 = vector.load %arg2[%c0_3, %c0_4] : memref<1x32xf32, #tpu.memory_space<vmem>>, vector<1x32xf32>
    %4 = vector.broadcast %3 : vector<1x32xf32> to vector<8x32xf32>
    %5 = arith.addf %2, %4 : vector<8x32xf32>
    %6 = arith.mulf %5, %5 : vector<8x32xf32>
    %cst_5 = arith.constant dense<0.000000e+00> : vector<8xf32>
    %7 = vector.multi_reduction <add>, %6, %cst_5 [1] : vector<8x32xf32> to vector<8xf32>
    %8 = vector.shape_cast %7 : vector<8xf32> to vector<8x1xf32>
    %cst_6 = arith.constant 1.000000e-16 : f32
    %9 = vector.broadcast %cst_6 : f32 to vector<8x1xf32>
    %10 = arith.maximumf %8, %9 : vector<8x1xf32>
    %11 = math.rsqrt %10 : vector<8x1xf32>
    %12 = vector.broadcast %11 : vector<8x1xf32> to vector<8x32xf32>
    %13 = arith.mulf %5, %12 : vector<8x32xf32>
    %c0_7 = arith.constant 0 : index
    %c0_8 = arith.constant 0 : index
    %14 = vector.load %arg3[%c0_7, %c0_8] : memref<8x32xf32, #tpu.memory_space<vmem>>, vector<8x32xf32>
    tpu.vector_store %arg3[%c0_7, %c0_8], %13 {strides = array<i32>} : memref<8x32xf32, #tpu.memory_space<vmem>>, vector<8x32xf32>,
    return
  }
}

</mosaic_0001>

<bundles_post_ra>
// kernel: tpu_custom_call.1
= control target key start
LH: loop header
LB: loop body
LE: loop exit
PB: predicated region body
PF: predicated region fallthrough
CT: control target
= control target key end

     0   :  { %8 = vsyncpa [#allocation3], 0  ;;  %s286_s0 = inlined_call_operand.hbm [shape: f32[8,32], index: 0, kind: input, shape index: {}]   ;;  %s287_s1 = inlined_call_operand.hbm [shape: f32[32,32], index: 1, kind: input, shape index: {}]   ;;  %s288_s2 = inlined_call_operand.vmem [shape: f32[1,32], index: 2, kind: input, shape index: {}]   ;;  %s289_s3 = inlined_call_operand.hbm [shape: f32[8,32], index: 3, kind: output, shape index: {}]  }
   0x1   :  { %9 = vsyncpa [#allocation6], 0 }
   0x2   :  { %10 = vsyncpa [#allocation4], 0  ;;  %s244_s12 = smov [#allocation2]   ;;  %s245_s14 = smov [#allocation5]  }
   0x3   :  { %s17_s13 = sshll.u32 %s244_s12, 4  ;;  %s26_s15 = sshll.u32 %s245_s14, 4  ;;  %s18_s13 = int_to_ptr.vmem [resolvable:$true] %s17_s13  ;;  %s27_s15 = int_to_ptr.vmem [resolvable:$true] %s26_s15 }
   0x4   :  { %s186_s16 = scalar_lea.vmem %s18_s13, 128  ;;  %p191_p1 = scmp.lt.s32.totalorder %s18_s13, %s18_s13 }
   0x5   :  { %p187_p0 = scmp.ne.s32.totalorder %s18_s13, %s186_s16  ;;  %p192_p2 = scmp.lt.s32.totalorder %s186_s16, %s186_s16 }
   0x7   :  { %p193_p3 = por %p192_p2, %p191_p1 }
   0x9   :  { %p194_p4 = pnand %p193_p3, %p187_p0 }
   0xb   :  { %197 = shalt.err (!%p194_p4)
}
   0xc   :  { %20 = dma.hbm_to_vmem [thread:$0]  %s286_s0, 128, %s18_s13, [#allocation3]  }
   0xd   :  { %s206_s19 = scalar_lea.vmem %s27_s15, 512  ;;  %p211_p6 = scmp.lt.s32.totalorder %s27_s15, %s27_s15 }
   0xe   :  { %p207_p5 = scmp.ne.s32.totalorder %s27_s15, %s206_s19  ;;  %p212_p7 = scmp.lt.s32.totalorder %s206_s19, %s206_s19 }
  0x10   :  { %p213_p8 = por %p212_p7, %p211_p6 }
  0x12   :  { %p214_p9 = pnand %p213_p8, %p207_p5 }
  0x14   :  { %217 = shalt.err (!%p214_p9)
}
  0x15   :  { %s246_s20 = smov 128   ;;  %s247_s21 = smov 8  }
  0x16   :  { %32 = dma.hbm_to_vmem [thread:$0]  %s287_s1, 512, %s27_s15, [#allocation6], %s246_s20, %s246_s20, %s247_s21  }
  0x17   :  { %238 = dma.done.wait [#allocation3], 128  }
  0x18   :  { %239 = vsyncadd [#allocation3], 4294967168 }
  0x19   :  { %240 = dma.done.wait [#allocation6], 512  }
  0x1a   :  { %241 = vsyncadd [#allocation6], 4294966784  ;;  %v248_v0 = vmov 0.0   ;;  %vm249_vm0 = vmmov 0   ;;  %v45_v1 = vld [vmem:[#allocation5 + $0x18] sm:$0xff]  ;;  %v44_v2 = vld [vmem:[#allocation5 + $0x10] sm:$0xff] }
  0x1b   :  { %158 = vmatprep.subr.mxu0 %v248_v0  ;;  %166 = vmatprep.mubr.msk.f32.mxu0 %vm249_vm0, %v248_v0  ;;  %v43_v3 = vld [vmem:[#allocation5 + $0x8] sm:$0xff]  ;;  %v42_v4 = vld [vmem:[#allocation5] sm:$0xff]  ;;  %v41_v5 = vld [vmem:[#allocation2] sm:$0xff]  ;;  %vm53_vm1 = vcmask 261120   ;;  %s250_s24 = smov [#allocation7]  }
  0x1c   :  { %159 = vmatpush3.msra.mxu0 %v45_v1  ;;  %v151_v6 = vld [vmem:[%s288_s2] ss:$0 sm:$0xff]  ;;  %s141_s25 = sshll.u32 %s250_s24, 4  ;;  %s142_s25 = int_to_ptr.vmem [resolvable:$true] %s141_s25 }
  0x1d   :  { %160 = vmatprep.subr.mxu0 %v248_v0  ;;  %s218_s26 = scalar_lea.vmem %s142_s25, 128  ;;  %p223_p11 = scmp.lt.s32.totalorder %s142_s25, %s142_s25 }
  0x1e   :  { %161 = vmatpush3.msra.mxu0 %v44_v2  ;;  %p219_p10 = scmp.ne.s32.totalorder %s142_s25, %s218_s26  ;;  %p224_p12 = scmp.lt.s32.totalorder %s218_s26, %s218_s26 }
  0x1f   :  { %162 = vmatprep.subr.mxu0 %v248_v0 }
  0x20   :  { %163 = vmatpush3.msra.mxu0 %v43_v3  ;;  %p225_p13 = por %p224_p12, %p223_p11 }
  0x21   :  { %164 = vmatprep.subr.mxu0 %v248_v0 }
  0x22   :  { %165 = vmatpush3.msra.mxu0 %v42_v4  ;;  %p226_p0 = pnand %p225_p13, %p219_p10 }
  0x23   :  { %167 = vmatmul.mubr.msk.f32.vlgmr.msra.gmra.mxu0 %vm53_vm1, %v41_v5 }
  0xe3   :  { %v123_v7 = vpop.f32.mrf.mxu0 }
  0xe4   :  { %v124_v8 = vadd.f32 %v151_v6, %v123_v7 }
  0xe5   :  { %v168_v9 = vpop.f32.mrf.mxu0 }
  0xe6   :  { %v127_v10 = vmul.f32 %v124_v8, %v124_v8 }
  0xe8   :  { %v128_v11 = vsel %vm53_vm1, %v127_v10, 0.0 }
  0xe9   :  { %129 = vadd.xlane.f32.xlu0 %v128_v11 }
 0x172   :  { %v130_v12 = vpop.xlane.xlu0 %129 }
 0x173   :  { %v131_v13 = vmax.f32 %v130_v12, 1e-16 }
 0x175   :  { %176 = vrsqrt.f32 %v131_v13 }
 0x182   :  { %v177_v14 = vpop.eup %176 }
 0x183   :  { %v133_v15 = vmul.f32 %v177_v14, %v124_v8 }
 0x185   :  { %134 = vst.msk [vmem:[#allocation7] sm:$0xff] %vm53_vm1, %v133_v15 }
 0x186   :  { %229 = shalt.err (!%p226_p0)
}
 0x187   :  { %144 = dma.vmem_to_hbm [thread:$0]  %s142_s25, 128, %s289_s3, [#allocation4]  }
 0x188   :  { %242 = dma.done.wait [#allocation4], 128  }
 0x189   :  { %243 = vsyncadd [#allocation4], 4294967168 }
 0x18a   :  { %148 = vsyncpa [#allocation3], 1 }
 0x18b   :  { %149 = vsyncpa [#allocation6], 1 }
 0x18c   :  { %150 = vsyncpa [#allocation4], 1 }

</bundles_post_ra>
